<compile_context>
chip_gen: v6e
topology: v6e:2x2x1
jax: 0.10.0
libtpu: 0.0.40
codegen_flags: <defaults>
</compile_context>

<pallas_src>
import functools

import jax
import jax.numpy as jnp
from jax.experimental import pallas as pl
from jax.experimental.pallas import tpu as pltpu

D_IN, H1, H2, D_OUT = 1, 64, 32, 4


def _round_up(x, m):
    return ((x + m - 1) // m) * m


def mlp_kernel(x_ref, w1_ref, b1_ref, w2_ref, b2_ref, w3_ref, b3_ref, o_ref,
               *, use_bf16):
    # x_ref: (1, tb)         -- batch on lanes
    # w1: (64, 1)  b1: (64, 1)
    # w2: (32, 64) b2: (32, 1)
    # w3: (4, 32)  b3: (4, 1)
    # o_ref: (4, tb)
    x = x_ref[...]                                                      # (1, tb)

    # fc1: K=1 "matmul" is a pure broadcast outer-product -> VPU, not MXU.
    h1 = jnp.maximum(w1_ref[...] * x + b1_ref[...], 0.0)               # (64, tb)

    # fc2 / fc3 on the MXU, f32 accumulation.  Optional bf16 operands halve the
    # vmatmul passes (MXU is bf16-native) but relax numerics slightly.
    if use_bf16:
        w2 = w2_ref[...].astype(jnp.bfloat16)
        w3 = w3_ref[...].astype(jnp.bfloat16)
        h1m = h1.astype(jnp.bfloat16)
    else:
        w2, w3, h1m = w2_ref[...], w3_ref[...], h1

    h2 = jnp.dot(w2, h1m, preferred_element_type=jnp.float32)          # (32, tb)
    h2 = jnp.maximum(h2 + b2_ref[...], 0.0)
    h2m = h2.astype(jnp.bfloat16) if use_bf16 else h2

    out = jnp.dot(w3, h2m, preferred_element_type=jnp.float32)         # (4, tb)
    o_ref[...] = out + b3_ref[...]


def mlp_forward(x, params, *, tile_b=8192, transpose_output=True,
                use_bf16=False, x_buffer_count=2):
    """x: (B, 1) float32. params: PyTorch-layout weights (out,in), biases (out,1).

    Returns (B, 4) f32 (PyTorch orientation) if transpose_output else (4, B)
    feature-major (skips one extra HBM read+write pass on the output).
    """
    B = x.shape[0]

    # Lane tile: multiple of 128, big enough to amortize the ~0.35 us/step
    # pipeline overhead, small enough for scoped VMEM on every generation.
    # Prefer >= 2 grid steps when there's enough batch so the "parallel" axis
    # can shard across v7x's two TensorCores instead of collapsing to grid=(1,).
    tile_b = max(128, (int(tile_b) // 128) * 128)
    if B > 128:
        two_step = _round_up(pl.cdiv(B, 2), 128)
        tile_b = min(tile_b, two_step)
    else:
        tile_b = 128
    grid = (pl.cdiv(B, tile_b),)

    # Batch-on-lanes layout: (B, 1) -> (1, B) is a pure reshape (no data movement).
    xt = x.reshape(1, B)

    # Weights / biases are tiny: load full arrays for every tile (constant index_map).
    full = lambda shape: pl.BlockSpec(shape, lambda i: (0, 0))

    # Optional deeper input pipelining for x (cheap: 4*tile_b bytes per buffer);
    # useful on v5e if the x DMA shows up exposed in a profile.
    x_spec_kwargs = {}
    if x_buffer_count > 2:
        x_spec_kwargs["pipeline_mode"] = pl.Buffered(int(x_buffer_count))
    x_spec = pl.BlockSpec((1, tile_b), lambda i: (0, i), **x_spec_kwargs)

    # Per-step VMEM estimate (h1 dominates): raise the scoped-VMEM limit only
    # when very large tiles are requested; leave headroom for v7x (64 MiB phys).
    per_step_bytes = tile_b * 4 * (H1 + H2 + 2 * D_IN + 2 * D_OUT) + (1 << 20)
    cp_kwargs = dict(dimension_semantics=("parallel",))
    if per_step_bytes > (12 << 20):
        cp_kwargs["vmem_limit_bytes"] = min(2 * per_step_bytes, 48 << 20)

    out_t = pl.pallas_call(
        functools.partial(mlp_kernel, use_bf16=use_bf16),
        out_shape=jax.ShapeDtypeStruct((D_OUT, B), jnp.float32),
        grid_spec=pltpu.PrefetchScalarGridSpec(
            num_scalar_prefetch=0,
            grid=grid,
            in_specs=[
                x_spec,              # x^T tile (lane-dense)
                full((H1, D_IN)),    # w1
                full((H1, 1)),       # b1
                full((H2, H1)),      # w2
                full((H2, 1)),       # b2
                full((D_OUT, H2)),   # w3
                full((D_OUT, 1)),    # b3
            ],
            out_specs=pl.BlockSpec((D_OUT, tile_b), lambda i: (0, i)),  # lane-dense out
        ),
        compiler_params=pltpu.CompilerParams(**cp_kwargs),
    )(xt, params["w1"], params["b1"], params["w2"], params["b2"],
      params["w3"], params["b3"])

    if transpose_output:
        return out_t.T                                                  # (B, 4)
    return out_t                                                        # (4, B)


def init_params(key):
    """Deterministic init mimicking nn.Linear default (uniform +-1/sqrt(fan_in)).

    Weights stored PyTorch-style (out_features, in_features); biases (out_features, 1).
    """
    ks = jax.random.split(key, 6)

    def linear(kw, kb, fan_in, fan_out):
        bound = 1.0 / jnp.sqrt(jnp.float32(fan_in))
        w = jax.random.uniform(kw, (fan_out, fan_in), jnp.float32, -bound, bound)
        b = jax.random.uniform(kb, (fan_out, 1), jnp.float32, -bound, bound)
        return w, b

    w1, b1 = linear(ks[0], ks[1], D_IN, H1)
    w2, b2 = linear(ks[2], ks[3], H1, H2)
    w3, b3 = linear(ks[4], ks[5], H2, D_OUT)
    return {"w1": w1, "b1": b1, "w2": w2, "b2": b2, "w3": w3, "b3": b3}


def mlp_reference(x, p):
    h1 = jnp.maximum(x @ p["w1"].T + p["b1"].T, 0.0)
    h2 = jnp.maximum(h1 @ p["w2"].T + p["b2"].T, 0.0)
    return h2 @ p["w3"].T + p["b3"].T


if __name__ == "__main__":
    key = jax.random.PRNGKey(0)
    kx, kp, kx2 = jax.random.split(key, 3)
    params = init_params(kp)

    # Small batch (single tile, grid=(1,)).
    B = 16
    x = jax.random.normal(kx, (B, D_IN), jnp.float32)
    out = jax.block_until_ready(mlp_forward(x, params))
    ref = mlp_reference(x, params)
    assert out.shape == (B, D_OUT)
    assert jnp.allclose(out, ref, atol=1e-5, rtol=1e-5), "mismatch vs reference (B=16)"

    # Ragged multi-step batch (grid=(2,), partial last block, no wrapper-side pad).
    B2 = 300
    x2 = jax.random.normal(kx2, (B2, D_IN), jnp.float32)
    out2 = jax.block_until_ready(mlp_forward(x2, params))
    ref2 = mlp_reference(x2, params)
    assert out2.shape == (B2, D_OUT)
    assert jnp.allclose(out2, ref2, atol=1e-5, rtol=1e-5), "mismatch vs reference (B=300)"

    # Feature-major output path (no wrapper transpose), f32 MXU operands kept.
    out3 = jax.block_until_ready(
        mlp_forward(x2, params, transpose_output=False))
    assert out3.shape == (D_OUT, B2)
    assert jnp.allclose(out3.T, ref2, atol=1e-5, rtol=1e-5), "mismatch (feature-major)"

    print("KERNEL_OK")
</pallas_src>

<mosaic_0001>
module attributes {stable_mosaic.version = 11 : i64} {
  func.func @mlp_kernel(%arg0: i32, %arg1: memref<1x128xf32, #tpu.memory_space<vmem>>, %arg2: memref<64x1xf32, #tpu.memory_space<vmem>>, %arg3: memref<64x1xf32, #tpu.memory_space<vmem>>, %arg4: memref<32x64xf32, #tpu.memory_space<vmem>>, %arg5: memref<32x1xf32, #tpu.memory_space<vmem>>, %arg6: memref<4x32xf32, #tpu.memory_space<vmem>>, %arg7: memref<4x1xf32, #tpu.memory_space<vmem>>, %arg8: memref<4x128xf32, #tpu.memory_space<vmem>>) attributes {dimension_semantics = [#tpu.dimension_semantics<parallel>], iteration_bounds = array<i64: 1>, scalar_prefetch = 0 : i64, scratch_operands = 0 : i64, tpu.core_type = #tpu.core_type<tc>, window_params = [{transform_indices = @transform_0, window_bounds = array<i64: 1, 128>}, {pipeline_mode = #tpu.pipeline_mode<synchronous>, transform_indices = @transform_1, window_bounds = array<i64: 64, 1>}, {pipeline_mode = #tpu.pipeline_mode<synchronous>, transform_indices = @transform_2, window_bounds = array<i64: 64, 1>}, {pipeline_mode = #tpu.pipeline_mode<synchronous>, transform_indices = @transform_3, window_bounds = array<i64: 32, 64>}, {pipeline_mode = #tpu.pipeline_mode<synchronous>, transform_indices = @transform_4, window_bounds = array<i64: 32, 1>}, {pipeline_mode = #tpu.pipeline_mode<synchronous>, transform_indices = @transform_5, window_bounds = array<i64: 4, 32>}, {pipeline_mode = #tpu.pipeline_mode<synchronous>, transform_indices = @transform_6, window_bounds = array<i64: 4, 1>}, {transform_indices = @transform_7, window_bounds = array<i64: 4, 128>}]} {
    %c0 = arith.constant 0 : index
    %c0_0 = arith.constant 0 : index
    %0 = vector.load %arg1[%c0, %c0_0] : memref<1x128xf32, #tpu.memory_space<vmem>>, vector<1x128xf32>
    %c0_1 = arith.constant 0 : index
    %c0_2 = arith.constant 0 : index
    %1 = vector.load %arg2[%c0_1, %c0_2] : memref<64x1xf32, #tpu.memory_space<vmem>>, vector<64x1xf32>
    %2 = vector.broadcast %1 : vector<64x1xf32> to vector<64x128xf32>
    %3 = vector.broadcast %0 : vector<1x128xf32> to vector<64x128xf32>
    %4 = arith.mulf %2, %3 : vector<64x128xf32>
    %c0_3 = arith.constant 0 : index
    %c0_4 = arith.constant 0 : index
    %5 = vector.load %arg3[%c0_3, %c0_4] : memref<64x1xf32, #tpu.memory_space<vmem>>, vector<64x1xf32>
    %6 = vector.broadcast %5 : vector<64x1xf32> to vector<64x128xf32>
    %7 = arith.addf %4, %6 : vector<64x128xf32>
    %cst = arith.constant 0.000000e+00 : f32
    %8 = vector.broadcast %cst : f32 to vector<64x128xf32>
    %9 = arith.maximumf %7, %8 : vector<64x128xf32>
    %c0_5 = arith.constant 0 : index
    %c0_6 = arith.constant 0 : index
    %10 = vector.load %arg4[%c0_5, %c0_6] : memref<32x64xf32, #tpu.memory_space<vmem>>, vector<32x64xf32>
    %c0_7 = arith.constant 0 : index
    %c0_8 = arith.constant 0 : index
    %11 = vector.load %arg6[%c0_7, %c0_8] : memref<4x32xf32, #tpu.memory_space<vmem>>, vector<4x32xf32>
    %cst_9 = arith.constant dense<0.000000e+00> : vector<32x128xf32>
    %12 = tpu.matmul %10, %9, %cst_9 {dimension_numbers = #tpu.dot_dimension_numbers<[1], [0], [0], [1], [0, 0, 1, 1], [], []>} : vector<32x64xf32>, vector<64x128xf32>, vector<32x128xf32> -> vector<32x128xf32>
    %c0_10 = arith.constant 0 : index
    %c0_11 = arith.constant 0 : index
    %13 = vector.load %arg5[%c0_10, %c0_11] : memref<32x1xf32, #tpu.memory_space<vmem>>, vector<32x1xf32>
    %14 = vector.broadcast %13 : vector<32x1xf32> to vector<32x128xf32>
    %15 = arith.addf %12, %14 : vector<32x128xf32>
    %cst_12 = arith.constant 0.000000e+00 : f32
    %16 = vector.broadcast %cst_12 : f32 to vector<32x128xf32>
    %17 = arith.maximumf %15, %16 : vector<32x128xf32>
    %cst_13 = arith.constant dense<0.000000e+00> : vector<4x128xf32>
    %18 = tpu.matmul %11, %17, %cst_13 {dimension_numbers = #tpu.dot_dimension_numbers<[1], [0], [0], [1], [0, 0, 1, 1], [], []>} : vector<4x32xf32>, vector<32x128xf32>, vector<4x128xf32> -> vector<4x128xf32>
    %c0_14 = arith.constant 0 : index
    %c0_15 = arith.constant 0 : index
    %19 = vector.load %arg7[%c0_14, %c0_15] : memref<4x1xf32, #tpu.memory_space<vmem>>, vector<4x1xf32>
    %20 = vector.broadcast %19 : vector<4x1xf32> to vector<4x128xf32>
    %21 = arith.addf %18, %20 : vector<4x128xf32>
    %c0_16 = arith.constant 0 : index
    %c0_17 = arith.constant 0 : index
    %22 = vector.load %arg8[%c0_16, %c0_17] : memref<4x128xf32, #tpu.memory_space<vmem>>, vector<4x128xf32>
    tpu.vector_store %arg8[%c0_16, %c0_17], %21 {strides = array<i32>} : memref<4x128xf32, #tpu.memory_space<vmem>>, vector<4x128xf32>,
    return
  }
  func.func @transform_0(%arg0: i32) -> (i32, i32) {
    %c0_i32 = arith.constant 0 : i32
    %c0_i32_0 = arith.constant 0 : i32
    return %c0_i32, %arg0 : i32, i32
  }
  func.func @transform_1(%arg0: i32) -> (i32, i32) {
    %c0_i32 = arith.constant 0 : i32
    %c0_i32_0 = arith.constant 0 : i32
    %c0_i32_1 = arith.constant 0 : i32
    return %c0_i32, %c0_i32_0 : i32, i32
  }
  func.func @transform_2(%arg0: i32) -> (i32, i32) {
    %c0_i32 = arith.constant 0 : i32
    %c0_i32_0 = arith.constant 0 : i32
    %c0_i32_1 = arith.constant 0 : i32
    return %c0_i32, %c0_i32_0 : i32, i32
  }
  func.func @transform_3(%arg0: i32) -> (i32, i32) {
    %c0_i32 = arith.constant 0 : i32
    %c0_i32_0 = arith.constant 0 : i32
    %c0_i32_1 = arith.constant 0 : i32
    return %c0_i32, %c0_i32_0 : i32, i32
  }
  func.func @transform_4(%arg0: i32) -> (i32, i32) {
    %c0_i32 = arith.constant 0 : i32
    %c0_i32_0 = arith.constant 0 : i32
    %c0_i32_1 = arith.constant 0 : i32
    return %c0_i32, %c0_i32_0 : i32, i32
  }
  func.func @transform_5(%arg0: i32) -> (i32, i32) {
    %c0_i32 = arith.constant 0 : i32
    %c0_i32_0 = arith.constant 0 : i32
    %c0_i32_1 = arith.constant 0 : i32
    return %c0_i32, %c0_i32_0 : i32, i32
  }
  func.func @transform_6(%arg0: i32) -> (i32, i32) {
    %c0_i32 = arith.constant 0 : i32
    %c0_i32_0 = arith.constant 0 : i32
    %c0_i32_1 = arith.constant 0 : i32
    return %c0_i32, %c0_i32_0 : i32, i32
  }
  func.func @transform_7(%arg0: i32) -> (i32, i32) {
    %c0_i32 = arith.constant 0 : i32
    %c0_i32_0 = arith.constant 0 : i32
    return %c0_i32, %arg0 : i32, i32
  }
}

</mosaic_0001>

<bundles_post_ra>
// kernel: tpu_custom_call.1
= control target key start
LH: loop header
LB: loop body
LE: loop exit
PB: predicated region body
PF: predicated region fallthrough
CT: control target
= control target key end

     0   :  { %v464_v2 = vmov 0   ;;  %s596_s0 = inlined_call_operand.vmem [shape: f32[1,16], index: 0, kind: input, shape index: {}]   ;;  %s597_s1 = inlined_call_operand.vmem [shape: f32[64,1], index: 1, kind: input, shape index: {}]   ;;  %s598_s2 = inlined_call_operand.vmem [shape: f32[64,1], index: 2, kind: input, shape index: {}]   ;;  %s599_s3 = inlined_call_operand.vmem [shape: f32[32,64], index: 3, kind: input, shape index: {}]   ;;  %s600_s4 = inlined_call_operand.vmem [shape: f32[32,1], index: 4, kind: input, shape index: {}]   ;;  %s601_s5 = inlined_call_operand.vmem [shape: f32[4,32], index: 5, kind: input, shape index: {}]   ;;  %s602_s6 = inlined_call_operand.vmem [shape: f32[4,1], index: 6, kind: input, shape index: {}]   ;;  %s603_s7 = inlined_call_operand.hbm [shape: f32[4,16], index: 7, kind: output, shape index: {}]  }
   0x1   :  { %v97_v0 = vld [vmem:[%s598_s2 + $0x38] sm:$0xff]  ;;  %441 = vset.pattern.permute.xlu1 %v464_v2  ;;  %440 = vset.pattern.permute.xlu0 %v464_v2  ;;  %v34_v3 = vld [vmem:[%s597_s1 + $0x30] sm:$0xff]  ;;  %v33_v4 = vld [vmem:[%s597_s1 + $0x28] sm:$0xff] }
   0x2   :  { %v35_v1 = vld [vmem:[%s597_s1 + $0x38] sm:$0xff]  ;;  %135 = vperm.xlu1 %441, %v97_v0   ;;  %v96_v5 = vld [vmem:[%s598_s2 + $0x30] sm:$0xff]  ;;  %v32_v6 = vld [vmem:[%s597_s1 + $0x20] sm:$0xff] }
   0x3   :  { %73 = vperm.xlu0 %440, %v35_v1  }
   0x6   :  { %63 = vperm.xlu1 %441, %v33_v4  }
   0x7   :  { %68 = vperm.xlu0 %440, %v34_v3  }
   0x8   :  { %12 = vsyncpa [#allocation3], 0  ;;  %v95_v7 = vld [vmem:[%s598_s2 + $0x28] sm:$0xff]  ;;  %v31_v8 = vld [vmem:[%s597_s1 + $0x18] sm:$0xff]  ;;  %vm183_vm0 = vcmask 523264   ;;  %v465_v3 = vmov 0.0  }
   0x9   :  { %v94_v9 = vld [vmem:[%s598_s2 + $0x20] sm:$0xff]  ;;  %v30_v10 = vld [vmem:[%s597_s1 + $0x10] sm:$0xff]  ;;  %v93_v11 = vld [vmem:[%s598_s2 + $0x18] sm:$0xff]  ;;  %425 = vmatprep.subr.mxu1 %v465_v3  ;;  %vm466_vm1 = vmmov 0   ;;  %vm291_vm2 = vcmask 261120   ;;  %s467_s26 = smov [#allocation2]  }
   0xa   :  { %58 = vperm.xlu1 %441, %v32_v6   ;;  %v29_v12 = vld [vmem:[%s597_s1 + $0x8] sm:$0xff]  ;;  %v92_v13 = vld [vmem:[%s598_s2 + $0x10] sm:$0xff]  ;;  %v28_v14 = vld [vmem:[%s597_s1] sm:$0xff]  ;;  %433 = vmatprep.mubr.msk.f32.mxu1 %vm466_vm1, %v465_v3  ;;  %s372_s27 = sshll.u32 %s467_s26, 4  ;;  %s373_s27 = int_to_ptr.vmem [resolvable:$true] %s372_s27 }
   0xb   :  { %130 = vperm.xlu0 %440, %v96_v5   ;;  %v91_v15 = vld [vmem:[%s598_s2 + $0x8] sm:$0xff]  ;;  %v90_v16 = vld [vmem:[%s598_s2] sm:$0xff]  ;;  %v162_v17 = vld [vmem:[%s600_s4 + $0x18] sm:$0xff]  ;;  %s442_s28 = scalar_lea.vmem %s373_s27, 64  ;;  %p447_p1 = scmp.lt.s32.totalorder %s373_s27, %s373_s27 }
   0xc   :  { %v161_v18 = vld [vmem:[%s600_s4 + $0x10] sm:$0xff]  ;;  %v154_v19 = vld [vmem:[%s599_s3] sm:$0xff]  ;;  %v160_v20 = vld [vmem:[%s600_s4 + $0x8] sm:$0xff]  ;;  %p443_p0 = scmp.ne.s32.totalorder %s373_s27, %s442_s28  ;;  %p448_p2 = scmp.lt.s32.totalorder %s442_s28, %s442_s28 }
   0xd   :  { %419 = vmatprep.mubr.msk.f32.mxu0 %vm183_vm0, %v154_v19  ;;  %v159_v21 = vld [vmem:[%s600_s4] sm:$0xff]  ;;  %v155_v0 = vld [vmem:[%s599_s3 + $0x8] sm:$0xff]  ;;  %v156_v1 = vld [vmem:[%s599_s3 + $0x10] sm:$0xff] }
   0xe   :  { %53 = vperm.xlu1 %441, %v31_v8   ;;  %v285_v22 = vld [vmem:[%s602_s6] sm:$0xf]  ;;  %v157_v2 = vld [vmem:[%s599_s3 + $0x18] sm:$0xff]  ;;  %p449_p3 = por %p448_p2, %p447_p1 }
   0xf   :  { %125 = vperm.xlu0 %440, %v95_v7   ;;  %v380_v23 = vld [vmem:[%s596_s0] ss:$0 sm:$0xff] }
  0x10   :  { %p450_p4 = pnand %p449_p3, %p443_p0 }
  0x12   :  { %48 = vperm.xlu1 %441, %v30_v10  }
  0x13   :  { %120 = vperm.xlu0 %440, %v94_v9  }
  0x16   :  { %43 = vperm.xlu1 %441, %v29_v12  }
  0x17   :  { %115 = vperm.xlu0 %440, %v93_v11  }
  0x1a   :  { %38 = vperm.xlu1 %441, %v28_v14  }
  0x1b   :  { %110 = vperm.xlu0 %440, %v92_v13  }
  0x1e   :  { %100 = vperm.xlu1 %441, %v90_v16  }
  0x1f   :  { %105 = vperm.xlu0 %440, %v91_v15  }
  0x22   :  { %175 = vperm.xlu1 %441, %v161_v18  }
  0x23   :  { %180 = vperm.xlu0 %440, %v162_v17  }
  0x26   :  { %165 = vperm.xlu1 %441, %v159_v21  }
  0x27   :  { %170 = vperm.xlu0 %440, %v160_v20   ;;  %v158_v20 = vld [vmem:[%s601_s5] sm:$0xf] }
  0x2b   :  { %288 = vperm.xlu0 %440, %v285_v22  }
  0x7d   :  { %v136_v24 = vpop.permute.xlu1 %135 }
  0x7e   :  { %v74_v25 = vpop.permute.xlu0 %73 }
  0x7f   :  { %v89_v26 = vmul.f32 %v380_v23, %v74_v25 }
  0x81   :  { %v145_v27 = vadd.f32 %v136_v24, %v89_v26  ;;  %v64_v29 = vpop.permute.xlu1 %63 }
  0x82   :  { %v69_v28 = vpop.permute.xlu0 %68  ;;  %v87_v35 = vmul.f32 %v380_v23, %v64_v29 }
  0x83   :  { %v153_v30 = vmax.f32 %v145_v27, 0.0  ;;  %v88_v31 = vmul.f32 %v380_v23, %v69_v28 }
  0x85   :  { %403 = vmatprep.subr.mxu0 %v153_v30  ;;  %v59_v33 = vpop.permute.xlu1 %58 }
  0x86   :  { %v131_v32 = vpop.permute.xlu0 %130  ;;  %404 = vmatpush3.msra.mxu0 %v153_v30  ;;  %v86_v40 = vmul.f32 %v380_v23, %v59_v33 }
  0x87   :  { %v144_v34 = vadd.f32 %v131_v32, %v88_v31 }
  0x89   :  { %v152_v36 = vmax.f32 %v144_v34, 0.0  ;;  %v54_v38 = vpop.permute.xlu1 %53 }
  0x8a   :  { %v126_v37 = vpop.permute.xlu0 %125  ;;  %v85_v45 = vmul.f32 %v380_v23, %v54_v38 }
  0x8b   :  { %v143_v39 = vadd.f32 %v126_v37, %v87_v35  ;;  %405 = vmatprep.subr.mxu0 %v152_v36 }
  0x8c   :  { %406 = vmatpush3.msra.mxu0 %v152_v36 }
  0x8d   :  { %v151_v41 = vmax.f32 %v143_v39, 0.0  ;;  %v49_v43 = vpop.permute.xlu1 %48 }
  0x8e   :  { %v121_v42 = vpop.permute.xlu0 %120  ;;  %v84_v50 = vmul.f32 %v380_v23, %v49_v43 }
  0x8f   :  { %v142_v44 = vadd.f32 %v121_v42, %v86_v40  ;;  %407 = vmatprep.subr.mxu0 %v151_v41 }
  0x90   :  { %408 = vmatpush3.msra.mxu0 %v151_v41 }
  0x91   :  { %v150_v46 = vmax.f32 %v142_v44, 0.0  ;;  %v44_v48 = vpop.permute.xlu1 %43 }
  0x92   :  { %v116_v47 = vpop.permute.xlu0 %115  ;;  %v83_v55 = vmul.f32 %v380_v23, %v44_v48 }
  0x93   :  { %v141_v49 = vadd.f32 %v116_v47, %v85_v45  ;;  %409 = vmatprep.subr.mxu0 %v150_v46 }
  0x94   :  { %410 = vmatpush3.msra.mxu0 %v150_v46 }
  0x95   :  { %v149_v51 = vmax.f32 %v141_v49, 0.0  ;;  %v39_v53 = vpop.permute.xlu1 %38 }
  0x96   :  { %v111_v52 = vpop.permute.xlu0 %110  ;;  %v82_v57 = vmul.f32 %v380_v23, %v39_v53 }
  0x97   :  { %v140_v54 = vadd.f32 %v111_v52, %v84_v50  ;;  %411 = vmatprep.subr.mxu0 %v149_v51 }
  0x98   :  { %412 = vmatpush3.msra.mxu0 %v149_v51 }
  0x99   :  { %v148_v56 = vmax.f32 %v140_v54, 0.0  ;;  %v101_v59 = vpop.permute.xlu1 %100 }
  0x9a   :  { %v106_v58 = vpop.permute.xlu0 %105  ;;  %v138_v61 = vadd.f32 %v101_v59, %v82_v57 }
  0x9b   :  { %v139_v60 = vadd.f32 %v106_v58, %v83_v55  ;;  %413 = vmatprep.subr.mxu0 %v148_v56 }
  0x9c   :  { %414 = vmatpush3.msra.mxu0 %v148_v56  ;;  %v146_v63 = vmax.f32 %v138_v61, 0.0 }
  0x9d   :  { %v147_v62 = vmax.f32 %v139_v60, 0.0  ;;  %v176_v6 = vpop.permute.xlu1 %175 }
  0x9e   :  { %v181_v4 = vpop.permute.xlu0 %180 }
  0x9f   :  { %415 = vmatprep.subr.mxu0 %v147_v62 }
  0xa0   :  { %416 = vmatpush3.msra.mxu0 %v147_v62 }
  0xa1   :  { %417 = vmatprep.subr.mxu0 %v146_v63  ;;  %v166_v15 = vpop.permute.xlu1 %165 }
  0xa2   :  { %418 = vmatpush3.msra.mxu0 %v146_v63  ;;  %v171_v10 = vpop.permute.xlu0 %170 }
  0xa3   :  { %420 = vmatmul.mubr.msk.f32.vlgmr.msra.gmra.mxu0 %vm183_vm0, %v155_v0 }
  0xa4   :  { %422 = vmatprep.mubr.msk.f32.mxu0 %vm183_vm0, %v156_v1 }
  0xa6   :  { %v289_v21 = vpop.permute.xlu0 %288 }
  0xa7   :  { %423 = vmatmul.mubr.msk.f32.gmra.mxu0 %vm183_vm0, %v157_v2 }
 0x163   :  { %v421_v5 = vpop.f32.mrf.mxu0 }
 0x164   :  { %v268_v12 = vadd.f32 %v421_v5, %v171_v10 }
 0x165   :  { %v262_v7 = vpop.f32.mrf.mxu0 }
 0x166   :  { %v263_v16 = vadd.f32 %v262_v7, %v166_v15  ;;  %v282_v18 = vmax.f32 %v268_v12, 0.0 }
 0x167   :  { %v424_v8 = vpop.f32.mrf.mxu0 }
 0x168   :  { %v278_v9 = vadd.f32 %v424_v8, %v181_v4  ;;  %v281_v19 = vmax.f32 %v263_v16, 0.0 }
 0x169   :  { %v272_v11 = vpop.f32.mrf.mxu0 }
 0x16a   :  { %v284_v13 = vmax.f32 %v278_v9, 0.0  ;;  %v273_v14 = vadd.f32 %v272_v11, %v176_v6 }
 0x16c   :  { %v283_v17 = vmax.f32 %v273_v14, 0.0  ;;  %426 = vmatpush3.msra.mxu1 %v284_v13 }
 0x16d   :  { %427 = vmatprep.subr.mxu1 %v465_v3 }
 0x16e   :  { %428 = vmatpush3.msra.mxu1 %v283_v17 }
 0x16f   :  { %429 = vmatprep.subr.mxu1 %v465_v3 }
 0x170   :  { %430 = vmatpush3.msra.mxu1 %v282_v18 }
 0x171   :  { %431 = vmatprep.subr.mxu1 %v465_v3 }
 0x172   :  { %432 = vmatpush3.msra.mxu1 %v281_v19 }
 0x173   :  { %434 = vmatmul.mubr.msk.f32.vlgmr.msra.gmra.mxu1 %vm291_vm2, %v158_v20 }
 0x233   :  { %v361_v22 = vpop.f32.mrf.mxu1 }
 0x234   :  { %v362_v23 = vadd.f32 %v361_v22, %v289_v21 }
 0x235   :  { %v435_v24 = vpop.f32.mrf.mxu1 }
 0x236   :  { %365 = vst [vmem:[#allocation2] sm:$0xf] %v362_v23 }
 0x237   :  { %453 = shalt.err (!%p450_p4)
}
 0x238   :  { %375 = dma.vmem_to_hbm [thread:$0]  %s373_s27, 64, %s603_s7, [#allocation3]  }
 0x239   :  { %462 = dma.done.wait [#allocation3], 64  }
 0x23a   :  { %463 = vsyncadd [#allocation3], 4294967232 }
 0x23b   :  { %379 = vsyncpa [#allocation3], 1 }

</bundles_post_ra>
